<compile_context>
chip_gen: v6e
topology: v6e:2x2x1
jax: 0.10.0
libtpu: 0.0.40
codegen_flags: <defaults>
</compile_context>

<pallas_src>
import jax
import jax.numpy as jnp
from jax.experimental import pallas as pl
from jax.experimental.pallas import tpu as pltpu

T_CLASSES = 288      # time-of-day classes
N_DOW = 7            # day-of-week classes
N_DOW_PAD = 8        # padded to one full sublane group
FEAT = N_DOW + T_CLASSES  # 295


def tem_embedding_kernel(idx_ref, w1d_ref, w1t_ref, b1_ref, w2_ref, b2_ref,
                         out_ref):
    tm = idx_ref.shape[1]
    dow = idx_ref[0:1, :]                       # (1, tm) int32 in [0, 7)
    tod = idx_ref[1:2, :]                       # (1, tm) int32 in [0, 288)

    # Transposed one-hots: classes along sublanes, rows along lanes.  Both are
    # exact vreg multiples (8 and 288 sublanes), so no lane-padded (tm, 295)
    # intermediate is ever built and the iota is a cheap sublane iota.
    cls_dow = jax.lax.broadcasted_iota(jnp.int32, (N_DOW_PAD, tm), 0)
    cls_tod = jax.lax.broadcasted_iota(jnp.int32, (T_CLASSES, tm), 0)
    oh_dow = (cls_dow == dow).astype(jnp.float32)          # (8,   tm)
    oh_tod = (cls_tod == tod).astype(jnp.float32)          # (288, tm)

    # FeedForward([295, D, D]) with W1 split into its day-of-week and
    # time-of-day row blocks; everything transposed so the output is (D, tm).
    h = (jnp.dot(w1d_ref[...], oh_dow, preferred_element_type=jnp.float32)
         + jnp.dot(w1t_ref[...], oh_tod, preferred_element_type=jnp.float32)
         + b1_ref[...])
    h = jnp.maximum(h, 0.0)
    out = (jnp.dot(w2_ref[...], h, preferred_element_type=jnp.float32)
           + b2_ref[...])
    out_ref[...] = out.astype(out_ref.dtype)               # lane-dense store


def _round_up(x, m):
    return (x + m - 1) // m * m


def _choose_tiling(M, tile_cap):
    """Row-tile size, padded row count, grid steps.

    Tiles are multiples of 128 (lane-dense blocks) except for tiny inputs
    where a single full-extent block is used; for large inputs the step count
    is kept even so both v7x TensorCores get balanced work.
    """
    m8 = _round_up(M, 8)
    if m8 <= 256:
        return m8, m8, 1
    steps = pl.cdiv(m8, tile_cap)
    if steps == 1:
        steps = 2                       # give both v7x TCs a grid step
    elif steps % 2:
        steps += 1                      # balanced work on a 2-TC chip
    tile = _round_up(pl.cdiv(m8, steps), 128)
    m_pad = _round_up(M, tile)
    return tile, m_pad, m_pad // tile


def tem_embedding(TE, w1, b1, w2, b2, *, tile_m=2048):
    """TE: [B, T, 2] int -> [B, T, 1, D] float32.

    w1: (295, D), b1: (D,), w2: (D, D), b2: (D,)  (x @ w + b convention).
    """
    B, T, _ = TE.shape
    D = w1.shape[1]
    M = B * T

    tile, m_pad, grid_m = _choose_tiling(M, tile_m)

    # ---- hoisted index math, (2, M) layout for dense per-tile DMA slabs -----
    te = TE.reshape(M, 2).astype(jnp.int32)
    idx = jnp.stack([te[:, 0] % N_DOW, te[:, 1] % T_CLASSES], axis=0)  # (2, M)
    if m_pad != M:
        idx = jnp.pad(idx, ((0, 0), (0, m_pad - M)))   # pad cols are discarded

    # ---- weights transposed for the (D, tm) layout; f32 throughout ----------
    w1f = w1.astype(jnp.float32)
    w1d_t = jnp.pad(w1f[:N_DOW].T, ((0, 0), (0, N_DOW_PAD - N_DOW)))  # (D, 8)
    w1t_t = w1f[N_DOW:].T                                             # (D, 288)
    w2_t = w2.astype(jnp.float32).T                                   # (D, D)
    b1_c = b1.astype(jnp.float32).reshape(D, 1)
    b2_c = b2.astype(jnp.float32).reshape(D, 1)

    out_t = pl.pallas_call(
        tem_embedding_kernel,
        out_shape=jax.ShapeDtypeStruct((D, m_pad), jnp.float32),
        grid_spec=pltpu.PrefetchScalarGridSpec(
            num_scalar_prefetch=0,
            grid=(grid_m,),
            in_specs=[
                pl.BlockSpec((2, tile), lambda i: (0, i)),          # [dow; tod]
                pl.BlockSpec((D, N_DOW_PAD), lambda i: (0, 0)),     # W1 dow^T
                pl.BlockSpec((D, T_CLASSES), lambda i: (0, 0)),     # W1 tod^T
                pl.BlockSpec((D, 1), lambda i: (0, 0)),             # b1
                pl.BlockSpec((D, D), lambda i: (0, 0)),             # W2^T
                pl.BlockSpec((D, 1), lambda i: (0, 0)),             # b2
            ],
            out_specs=pl.BlockSpec((D, tile), lambda i: (0, i)),
        ),
        compiler_params=pltpu.CompilerParams(
            dimension_semantics=("parallel",)),
    )(idx, w1d_t, w1t_t, b1_c, w2_t, b2_c)

    return out_t[:, :M].T.reshape(B, T, 1, D)


def _reference(TE, w1, b1, w2, b2):
    dow = jax.nn.one_hot(TE[..., 0] % N_DOW, N_DOW, dtype=jnp.float32)
    tod = jax.nn.one_hot(TE[..., 1] % T_CLASSES, T_CLASSES, dtype=jnp.float32)
    x = jnp.concatenate([dow, tod], axis=-1)[:, :, None, :]
    h = jnp.maximum(x @ w1 + b1, 0.0)
    return h @ w2 + b2


if __name__ == "__main__":
    D = 32
    key = jax.random.PRNGKey(0)
    k1, k2, k3, k4, k5, k6 = jax.random.split(key, 6)

    # deterministic parameter init (PyTorch Linear default: U(-1/sqrt(fan_in), .))
    bound1 = 1.0 / jnp.sqrt(float(FEAT))
    bound2 = 1.0 / jnp.sqrt(float(D))
    w1 = jax.random.uniform(k1, (FEAT, D), jnp.float32, -bound1, bound1)
    b1 = jax.random.uniform(k2, (D,), jnp.float32, -bound1, bound1)
    w2 = jax.random.uniform(k3, (D, D), jnp.float32, -bound2, bound2)
    b2 = jax.random.uniform(k4, (D,), jnp.float32, -bound2, bound2)

    ok = True
    # (B, T) cases: tiny single-tile path and a multi-tile + row-padding path.
    for (B, T) in [(2, 8), (3, 100)]:
        kd, kt = jax.random.split(jax.random.fold_in(k5, B * 1000 + T), 2)
        dow_idx = jax.random.randint(kd, (B, T, 1), 0, N_DOW)
        tod_idx = jax.random.randint(kt, (B, T, 1), 0, T_CLASSES)
        TE = jnp.concatenate([dow_idx, tod_idx], axis=-1).astype(jnp.int32)

        out = jax.block_until_ready(tem_embedding(TE, w1, b1, w2, b2))
        ref = _reference(TE, w1, b1, w2, b2)

        assert out.shape == (B, T, 1, D), out.shape
        err = float(jnp.max(jnp.abs(out - ref)))
        assert jnp.allclose(out, ref, atol=1e-4, rtol=1e-4), (
            "max abs diff = %f (B=%d, T=%d)" % (err, B, T))
        ok = ok and True

    if ok:
        print("KERNEL_OK")
</pallas_src>

<mosaic_0001>
module attributes {stable_mosaic.version = 11 : i64} {
  func.func @tem_embedding_kernel(%arg0: i32, %arg1: memref<2x16xi32, #tpu.memory_space<vmem>>, %arg2: memref<32x8xf32, #tpu.memory_space<vmem>>, %arg3: memref<32x288xf32, #tpu.memory_space<vmem>>, %arg4: memref<32x1xf32, #tpu.memory_space<vmem>>, %arg5: memref<32x32xf32, #tpu.memory_space<vmem>>, %arg6: memref<32x1xf32, #tpu.memory_space<vmem>>, %arg7: memref<32x16xf32, #tpu.memory_space<vmem>>) attributes {dimension_semantics = [#tpu.dimension_semantics<parallel>], iteration_bounds = array<i64: 1>, scalar_prefetch = 0 : i64, scratch_operands = 0 : i64, tpu.core_type = #tpu.core_type<tc>, window_params = [{transform_indices = @transform_0, window_bounds = array<i64: 2, 16>}, {pipeline_mode = #tpu.pipeline_mode<synchronous>, transform_indices = @transform_1, window_bounds = array<i64: 32, 8>}, {pipeline_mode = #tpu.pipeline_mode<synchronous>, transform_indices = @transform_2, window_bounds = array<i64: 32, 288>}, {pipeline_mode = #tpu.pipeline_mode<synchronous>, transform_indices = @transform_3, window_bounds = array<i64: 32, 1>}, {pipeline_mode = #tpu.pipeline_mode<synchronous>, transform_indices = @transform_4, window_bounds = array<i64: 32, 32>}, {pipeline_mode = #tpu.pipeline_mode<synchronous>, transform_indices = @transform_5, window_bounds = array<i64: 32, 1>}, {transform_indices = @transform_6, window_bounds = array<i64: 32, 16>}]} {
    %c0 = arith.constant 0 : index
    %c0_0 = arith.constant 0 : index
    %0 = vector.load %arg1[%c0, %c0_0] : memref<2x16xi32, #tpu.memory_space<vmem>>, vector<1x16xi32>
    %c1 = arith.constant 1 : index
    %c0_1 = arith.constant 0 : index
    %1 = vector.load %arg1[%c1, %c0_1] : memref<2x16xi32, #tpu.memory_space<vmem>>, vector<1x16xi32>
    %2 = tpu.iota {dimensions = array<i32: 0>} : vector<8x16xi32>
    %3 = tpu.iota {dimensions = array<i32: 0>} : vector<288x16xi32>
    %4 = vector.broadcast %0 : vector<1x16xi32> to vector<8x16xi32>
    %5 = arith.cmpi eq, %2, %4 : vector<8x16xi32>
    %6 = arith.extui %5 : vector<8x16xi1> to vector<8x16xi32>
    %7 = arith.sitofp %6 : vector<8x16xi32> to vector<8x16xf32>
    %8 = vector.broadcast %1 : vector<1x16xi32> to vector<288x16xi32>
    %9 = arith.cmpi eq, %3, %8 : vector<288x16xi32>
    %10 = arith.extui %9 : vector<288x16xi1> to vector<288x16xi32>
    %11 = arith.sitofp %10 : vector<288x16xi32> to vector<288x16xf32>
    %c0_2 = arith.constant 0 : index
    %c0_3 = arith.constant 0 : index
    %12 = vector.load %arg2[%c0_2, %c0_3] : memref<32x8xf32, #tpu.memory_space<vmem>>, vector<32x8xf32>
    %cst = arith.constant dense<0.000000e+00> : vector<32x16xf32>
    %13 = tpu.matmul %12, %7, %cst {dimension_numbers = #tpu.dot_dimension_numbers<[1], [0], [0], [1], [0, 0, 1, 1], [], []>} : vector<32x8xf32>, vector<8x16xf32>, vector<32x16xf32> -> vector<32x16xf32>
    %c0_4 = arith.constant 0 : index
    %c0_5 = arith.constant 0 : index
    %14 = vector.load %arg3[%c0_4, %c0_5] : memref<32x288xf32, #tpu.memory_space<vmem>>, vector<32x288xf32>
    %cst_6 = arith.constant dense<0.000000e+00> : vector<32x16xf32>
    %15 = tpu.matmul %14, %11, %cst_6 {dimension_numbers = #tpu.dot_dimension_numbers<[1], [0], [0], [1], [0, 0, 1, 1], [], []>} : vector<32x288xf32>, vector<288x16xf32>, vector<32x16xf32> -> vector<32x16xf32>
    %16 = arith.addf %13, %15 : vector<32x16xf32>
    %c0_7 = arith.constant 0 : index
    %c0_8 = arith.constant 0 : index
    %17 = vector.load %arg4[%c0_7, %c0_8] : memref<32x1xf32, #tpu.memory_space<vmem>>, vector<32x1xf32>
    %18 = vector.broadcast %17 : vector<32x1xf32> to vector<32x16xf32>
    %19 = arith.addf %16, %18 : vector<32x16xf32>
    %cst_9 = arith.constant 0.000000e+00 : f32
    %20 = vector.broadcast %cst_9 : f32 to vector<32x16xf32>
    %21 = arith.maximumf %19, %20 : vector<32x16xf32>
    %c0_10 = arith.constant 0 : index
    %c0_11 = arith.constant 0 : index
    %22 = vector.load %arg5[%c0_10, %c0_11] : memref<32x32xf32, #tpu.memory_space<vmem>>, vector<32x32xf32>
    %cst_12 = arith.constant dense<0.000000e+00> : vector<32x16xf32>
    %23 = tpu.matmul %22, %21, %cst_12 {dimension_numbers = #tpu.dot_dimension_numbers<[1], [0], [0], [1], [0, 0, 1, 1], [], []>} : vector<32x32xf32>, vector<32x16xf32>, vector<32x16xf32> -> vector<32x16xf32>
    %c0_13 = arith.constant 0 : index
    %c0_14 = arith.constant 0 : index
    %24 = vector.load %arg6[%c0_13, %c0_14] : memref<32x1xf32, #tpu.memory_space<vmem>>, vector<32x1xf32>
    %25 = vector.broadcast %24 : vector<32x1xf32> to vector<32x16xf32>
    %26 = arith.addf %23, %25 : vector<32x16xf32>
    %c0_15 = arith.constant 0 : index
    %c0_16 = arith.constant 0 : index
    %27 = vector.load %arg7[%c0_15, %c0_16] : memref<32x16xf32, #tpu.memory_space<vmem>>, vector<32x16xf32>
    tpu.vector_store %arg7[%c0_15, %c0_16], %26 {strides = array<i32>} : memref<32x16xf32, #tpu.memory_space<vmem>>, vector<32x16xf32>,
    return
  }
  func.func @transform_0(%arg0: i32) -> (i32, i32) {
    %c0_i32 = arith.constant 0 : i32
    %c0_i32_0 = arith.constant 0 : i32
    return %c0_i32, %arg0 : i32, i32
  }
  func.func @transform_1(%arg0: i32) -> (i32, i32) {
    %c0_i32 = arith.constant 0 : i32
    %c0_i32_0 = arith.constant 0 : i32
    %c0_i32_1 = arith.constant 0 : i32
    return %c0_i32, %c0_i32_0 : i32, i32
  }
  func.func @transform_2(%arg0: i32) -> (i32, i32) {
    %c0_i32 = arith.constant 0 : i32
    %c0_i32_0 = arith.constant 0 : i32
    %c0_i32_1 = arith.constant 0 : i32
    return %c0_i32, %c0_i32_0 : i32, i32
  }
  func.func @transform_3(%arg0: i32) -> (i32, i32) {
    %c0_i32 = arith.constant 0 : i32
    %c0_i32_0 = arith.constant 0 : i32
    %c0_i32_1 = arith.constant 0 : i32
    return %c0_i32, %c0_i32_0 : i32, i32
  }
  func.func @transform_4(%arg0: i32) -> (i32, i32) {
    %c0_i32 = arith.constant 0 : i32
    %c0_i32_0 = arith.constant 0 : i32
    %c0_i32_1 = arith.constant 0 : i32
    return %c0_i32, %c0_i32_0 : i32, i32
  }
  func.func @transform_5(%arg0: i32) -> (i32, i32) {
    %c0_i32 = arith.constant 0 : i32
    %c0_i32_0 = arith.constant 0 : i32
    %c0_i32_1 = arith.constant 0 : i32
    return %c0_i32, %c0_i32_0 : i32, i32
  }
  func.func @transform_6(%arg0: i32) -> (i32, i32) {
    %c0_i32 = arith.constant 0 : i32
    %c0_i32_0 = arith.constant 0 : i32
    return %c0_i32, %arg0 : i32, i32
  }
}

</mosaic_0001>

<bundles_post_ra>
// kernel: tpu_custom_call.1
= control target key start
LH: loop header
LB: loop body
LE: loop exit
PB: predicated region body
PF: predicated region fallthrough
CT: control target
= control target key end

     0   :  { %11 = vsyncpa [#allocation3], 0  ;;  %s877_s21 = smov [#allocation2]   ;;  %s1153_s0 = inlined_call_operand.vmem [shape: s32[2,16], index: 0, kind: input, shape index: {}]   ;;  %s1154_s1 = inlined_call_operand.vmem [shape: f32[32,8], index: 1, kind: input, shape index: {}]   ;;  %s1155_s2 = inlined_call_operand.vmem [shape: f32[32,288], index: 2, kind: input, shape index: {}]   ;;  %s1156_s3 = inlined_call_operand.vmem [shape: f32[32,1], index: 3, kind: input, shape index: {}]   ;;  %s1157_s4 = inlined_call_operand.hbm [shape: f32[32,32], index: 4, kind: input, shape index: {}]   ;;  %s1158_s5 = inlined_call_operand.vmem [shape: f32[32,1], index: 5, kind: input, shape index: {}]   ;;  %s1159_s6 = inlined_call_operand.vmem [shape: f32[32,16], index: 6, kind: output, shape index: {}]  }
   0x1   :  { %s25_s22 = sshll.u32 %s877_s21, 4  ;;  %s26_s22 = int_to_ptr.vmem [resolvable:$true] %s25_s22 }
   0x2   :  { %s863_s23 = scalar_lea.vmem %s26_s22, 512  ;;  %p868_p1 = scmp.lt.s32.totalorder %s26_s22, %s26_s22 }
   0x3   :  { %p864_p0 = scmp.ne.s32.totalorder %s26_s22, %s863_s23  ;;  %p869_p2 = scmp.lt.s32.totalorder %s863_s23, %s863_s23 }
   0x5   :  { %p870_p3 = por %p869_p2, %p868_p1 }
   0x7   :  { %p871_p4 = pnand %p870_p3, %p864_p0 }
   0x9   :  { %874 = shalt.err (!%p871_p4)
}
   0xa   :  { %s878_s24 = smov 128   ;;  %s879_s25 = smov 8  }
   0xb   :  { %31 = dma.hbm_to_vmem [thread:$0]  %s1157_s4, 512, %s26_s22, [#allocation3], %s878_s24, %s878_s24, %s879_s25  }
   0xc   :  { %875 = dma.done.wait [#allocation3], 512  }
   0xd   :  { %876 = vsyncadd [#allocation3], 4294966784  ;;  %v39_v0 = vlaneseq  ;;  %v880_v2 = vmov 0   ;;  %v930_v8 = vld [vmem:[%s1153_s0 + $0x1] ss:$0 sm:$0xff]  ;;  %v881_v11 = vmov 1.0  }
   0xe   :  { %854 = vset.pattern.permute.xlu1 %v880_v2  ;;  %853 = vset.pattern.permute.xlu0 %v880_v2  ;;  %v201_v13 = vld [vmem:[%s1155_s2 + $0x10] sm:$0xff]  ;;  %vm211_vm4 = vcmask 261120   ;;  %v200_v15 = vld [vmem:[%s1155_s2 + $0x8] sm:$0xff]  ;;  %v659_v31 = vld [vmem:[%s1153_s0] ss:$0 sm:$0xff] }
   0xf   :  { %v920_v1 = vshrl.u32 %v39_v0, 7  ;;  %820 = vmatprep.mubr.msk.f32.mxu1 %vm211_vm4, %v201_v13  ;;  %288 = vmatprep.mubr.f32.mxu0 %v200_v15  ;;  %v204_v33 = vld [vmem:[%s1155_s2 + $0x28] sm:$0xff]  ;;  %v207_v35 = vld [vmem:[%s1155_s2 + $0x40] sm:$0xff]  ;;  %v210_v39 = vld [vmem:[%s1155_s2 + $0x58] sm:$0xff] }
  0x10   :  { %v195_v41 = vld [vmem:[%s1154_s1] sm:$0xff]  ;;  %v493_v43 = vld [vmem:[%s1156_s3 + $0x8] sm:$0xff]  ;;  %v495_v45 = vld [vmem:[%s1156_s3 + $0x18] sm:$0xff] }
  0x11   :  { %v71_v3 = vadd.s32 248, %v920_v1  ;;  %v55_v4 = vadd.s32 120, %v920_v1  ;;  %v70_v5 = vadd.s32 240, %v920_v1  ;;  %v54_v6 = vadd.s32 112, %v920_v1  ;;  %v196_v47 = vld [vmem:[%s1154_s1 + $0x8] sm:$0xff]  ;;  %v197_v49 = vld [vmem:[%s1154_s1 + $0x10] sm:$0xff]  ;;  %503 = vperm.xlu1 %854, %v493_v43   ;;  %513 = vperm.xlu0 %853, %v495_v45  }
  0x12   :  { %v69_v7 = vadd.s32 232, %v920_v1  ;;  %v53_v9 = vadd.s32 104, %v920_v1  ;;  %v68_v10 = vadd.s32 224, %v920_v1  ;;  %v52_v12 = vadd.s32 96, %v920_v1  ;;  %v492_v51 = vld [vmem:[%s1156_s3] sm:$0xff]  ;;  %v494_v52 = vld [vmem:[%s1156_s3 + $0x10] sm:$0xff] }
  0x13   :  { %vm118_vm0 = vcmp.eq.s32.totalorder %v71_v3, %v930_v8  ;;  %vm102_vm1 = vcmp.eq.s32.totalorder %v55_v4, %v930_v8  ;;  %vm117_vm2 = vcmp.eq.s32.totalorder %v70_v5, %v930_v8  ;;  %vm101_vm3 = vcmp.eq.s32.totalorder %v54_v6, %v930_v8  ;;  %v198_v53 = vld [vmem:[%s1154_s1 + $0x18] sm:$0xff]  ;;  %v529_v54 = vld [vmem:[%s1158_s5 + $0x8] sm:$0xff]  ;;  %v528_v55 = vld [vmem:[%s1158_s5] sm:$0xff] }
  0x14   :  { %747 = vmatprep.subr.msk.mxu0 %vm118_vm0, %v881_v11  ;;  %vm116_vm5 = vcmp.eq.s32.totalorder %v69_v7, %v930_v8  ;;  %v67_v14 = vadd.s32 216, %v920_v1  ;;  %vm100_vm6 = vcmp.eq.s32.totalorder %v53_v9, %v930_v8  ;;  %v51_v16 = vadd.s32 88, %v920_v1  ;;  %v199_v56 = vld [vmem:[%s1155_s2] sm:$0xff]  ;;  %v531_v58 = vld [vmem:[%s1158_s5 + $0x18] sm:$0xff]  ;;  %v530_v59 = vld [vmem:[%s1158_s5 + $0x10] sm:$0xff] }
  0x15   :  { %748 = vmatpush3.msk.msra.mxu0 %vm102_vm1, %v881_v11  ;;  %vm115_vm7 = vcmp.eq.s32.totalorder %v68_v10, %v930_v8  ;;  %v66_v17 = vadd.s32 208, %v920_v1  ;;  %vm99_vm8 = vcmp.eq.s32.totalorder %v52_v12, %v930_v8  ;;  %v50_v18 = vadd.s32 80, %v920_v1  ;;  %498 = vperm.xlu1 %854, %v492_v51   ;;  %v203_v57 = vld [vmem:[%s1155_s2 + $0x20] sm:$0xff]  ;;  %v202_v60 = vld [vmem:[%s1155_s2 + $0x18] sm:$0xff]  ;;  %v205_v62 = vld [vmem:[%s1155_s2 + $0x30] sm:$0xff] }
  0x16   :  { %749 = vmatprep.subr.msk.mxu0 %vm117_vm2, %v881_v11  ;;  %v75_v19 = vadd.s32 280, %v920_v1  ;;  %vm114_vm9 = vcmp.eq.s32.totalorder %v67_v14, %v930_v8  ;;  %v65_v20 = vadd.s32 200, %v920_v1  ;;  %vm98_vm10 = vcmp.eq.s32.totalorder %v51_v16, %v930_v8  ;;  %508 = vperm.xlu0 %853, %v494_v52   ;;  %v206_v61 = vld [vmem:[%s1155_s2 + $0x38] sm:$0xff]  ;;  %v209_v63 = vld [vmem:[%s1155_s2 + $0x50] sm:$0xff]  ;;  %v208_v0 = vld [vmem:[%s1155_s2 + $0x48] sm:$0xff] }
  0x17   :  { %750 = vmatpush3.msk.msra.mxu0 %vm101_vm3, %v881_v11  ;;  %v49_v21 = vadd.s32 72, %v920_v1  ;;  %vm113_vm12 = vcmp.eq.s32.totalorder %v66_v17, %v930_v8  ;;  %v64_v22 = vadd.s32 192, %v920_v1  ;;  %v74_v23 = vadd.s32 272, %v920_v1  ;;  %v526_v43 = vld [vmem:[#allocation2 + $0x10] sm:$0xff] }
  0x18   :  { %751 = vmatprep.subr.msk.mxu0 %vm116_vm5, %v881_v11  ;;  %vm122_vm11 = vcmp.eq.s32.totalorder %v75_v19, %v930_v8  ;;  %v73_v24 = vadd.s32 264, %v920_v1  ;;  %vm97_vm13 = vcmp.eq.s32.totalorder %v50_v18, %v930_v8  ;;  %v48_v25 = vadd.s32 64, %v920_v1 }
  0x19   :  { %752 = vmatpush3.msk.msra.mxu0 %vm100_vm6, %v881_v11  ;;  %812 = vmatprep.subr.msk.mxu1 %vm122_vm11, %v881_v11  ;;  %v72_v26 = vadd.s32 256, %v920_v1  ;;  %vm112_vm14 = vcmp.eq.s32.totalorder %v65_v20, %v930_v8  ;;  %v63_v27 = vadd.s32 184, %v920_v1  ;;  %vm121_vm15 = vcmp.eq.s32.totalorder %v74_v23, %v930_v8 }
  0x1a   :  { %753 = vmatprep.subr.msk.mxu0 %vm115_vm7, %v881_v11  ;;  %813 = vmatpush3.msk.msra.mxu1 %vm122_vm11, %v881_v11  ;;  %vm120_vm0 = vcmp.eq.s32.totalorder %v73_v24, %v930_v8  ;;  %vm96_vm1 = vcmp.eq.s32.totalorder %v49_v21, %v930_v8  ;;  %v47_v28 = vadd.s32 56, %v920_v1  ;;  %vm111_vm2 = vcmp.eq.s32.totalorder %v64_v22, %v930_v8 }
  0x1b   :  { %754 = vmatpush3.msk.msra.mxu0 %vm99_vm8, %v881_v11  ;;  %814 = vmatprep.subr.msk.mxu1 %vm121_vm15, %v881_v11  ;;  %v62_v29 = vadd.s32 176, %v920_v1  ;;  %vm119_vm3 = vcmp.eq.s32.totalorder %v72_v26, %v930_v8  ;;  %vm95_vm5 = vcmp.eq.s32.totalorder %v48_v25, %v930_v8  ;;  %v46_v30 = vadd.s32 48, %v920_v1 }
  0x1c   :  { %755 = vmatprep.subr.msk.mxu0 %vm114_vm9, %v881_v11  ;;  %815 = vmatpush3.msk.msra.mxu1 %vm121_vm15, %v881_v11  ;;  %vm110_vm6 = vcmp.eq.s32.totalorder %v63_v27, %v930_v8  ;;  %v61_v32 = vadd.s32 168, %v920_v1  ;;  %vm94_vm7 = vcmp.eq.s32.totalorder %v47_v28, %v930_v8  ;;  %v45_v34 = vadd.s32 40, %v920_v1 }
  0x1d   :  { %756 = vmatpush3.msk.msra.mxu0 %vm98_vm10, %v881_v11  ;;  %816 = vmatprep.subr.msk.mxu1 %vm120_vm0, %v881_v11  ;;  %vm109_vm8 = vcmp.eq.s32.totalorder %v62_v29, %v930_v8  ;;  %v60_v36 = vadd.s32 160, %v920_v1  ;;  %vm80_vm9 = vcmp.eq.s32.totalorder %v920_v1, %v659_v31  ;;  %vm93_vm10 = vcmp.eq.s32.totalorder %v46_v30, %v930_v8 }
  0x1e   :  { %757 = vmatprep.subr.msk.mxu0 %vm113_vm12, %v881_v11  ;;  %817 = vmatpush3.msk.msra.mxu1 %vm120_vm0, %v881_v11  ;;  %v44_v37 = vadd.s32 32, %v920_v1  ;;  %vm108_vm11 = vcmp.eq.s32.totalorder %v61_v32, %v930_v8  ;;  %v59_v38 = vadd.s32 152, %v920_v1  ;;  %vm92_vm12 = vcmp.eq.s32.totalorder %v45_v34, %v930_v8 }
  0x1f   :  { %758 = vmatpush3.msk.msra.mxu0 %vm97_vm13, %v881_v11  ;;  %818 = vmatprep.subr.msk.mxu1 %vm119_vm3, %v881_v11  ;;  %v43_v40 = vadd.s32 24, %v920_v1  ;;  %vm394_vm13 = vcmask 64512   ;;  %v58_v42 = vadd.s32 144, %v920_v1  ;;  %v42_v44 = vadd.s32 16, %v920_v1 }
  0x20   :  { %759 = vmatprep.subr.msk.mxu0 %vm112_vm14, %v881_v11  ;;  %819 = vmatpush3.msk.msra.mxu1 %vm119_vm3, %v881_v11  ;;  %vm107_vm14 = vcmp.eq.s32.totalorder %v60_v36, %v930_v8  ;;  %vm91_vm15 = vcmp.eq.s32.totalorder %v44_v37, %v930_v8  ;;  %vm106_vm0 = vcmp.eq.s32.totalorder %v59_v38, %v930_v8  ;;  %v57_v46 = vadd.s32 136, %v920_v1 }
  0x21   :  { %760 = vmatpush3.msk.msra.mxu0 %vm96_vm1, %v881_v11  ;;  %821 = vmatmul.mubr.msk.f32.vlgmr.msra.gmra.mxu1 %vm211_vm4, %v204_v33  ;;  %vm90_vm1 = vcmp.eq.s32.totalorder %v43_v40, %v930_v8  ;;  %v41_v48 = vadd.s32 8, %v920_v1  ;;  %v56_v50 = vadd.s32 128, %v920_v1  ;;  %vm89_vm3 = vcmp.eq.s32.totalorder %v42_v44, %v930_v8  ;;  %v527_v44 = vld [vmem:[#allocation2 + $0x18] sm:$0xff] }
  0x22   :  { %761 = vmatprep.subr.msk.mxu0 %vm111_vm2, %v881_v11  ;;  %823 = vmatprep.mubr.msk.f32.mxu1 %vm211_vm4, %v207_v35  ;;  %vm105_vm2 = vcmp.eq.s32.totalorder %v58_v42, %v930_v8  ;;  %v525_v42 = vld [vmem:[#allocation2 + $0x8] sm:$0xff] }
  0x23   :  { %762 = vmatpush3.msk.msra.mxu0 %vm95_vm5, %v881_v11  ;;  %826 = vmatprep.subr.msk.mxu1 %vm80_vm9, %v881_v11  ;;  %vm104_vm5 = vcmp.eq.s32.totalorder %v57_v46, %v930_v8 }
  0x24   :  { %763 = vmatprep.subr.msk.mxu0 %vm110_vm6, %v881_v11  ;;  %827 = vmatpush3.msk.msra.mxu1 %vm80_vm9, %v881_v11  ;;  %vm88_vm6 = vcmp.eq.s32.totalorder %v41_v48, %v930_v8  ;;  %vm649_vm9 = vcmask 130048  }
  0x25   :  { %764 = vmatpush3.msk.msra.mxu0 %vm94_vm7, %v881_v11  ;;  %824 = vmatmul.mubr.msk.f32.gmra.mxu1 %vm211_vm4, %v210_v39  ;;  %vm103_vm7 = vcmp.eq.s32.totalorder %v56_v50, %v930_v8 }
  0x26   :  { %765 = vmatprep.subr.msk.mxu0 %vm109_vm8, %v881_v11  ;;  %828 = vmatprep.mubr.msk.f32.mxu1 %vm394_vm13, %v195_v41  ;;  %vm87_vm8 = vcmp.eq.s32.totalorder %v920_v1, %v930_v8  ;;  %v524_v1 = vld [vmem:[#allocation2] sm:$0xff] }
  0x27   :  { %766 = vmatpush3.msk.msra.mxu0 %vm93_vm10, %v881_v11  ;;  %539 = vperm.xlu1 %854, %v529_v54  }
  0x28   :  { %767 = vmatprep.subr.msk.mxu0 %vm108_vm11, %v881_v11  ;;  %534 = vperm.xlu0 %853, %v528_v55  }
  0x29   :  { %768 = vmatpush3.msk.msra.mxu0 %vm92_vm12, %v881_v11  ;;  %829 = vmatmul.mubr.msk.f32.vlgmr.msra.gmra.mxu1 %vm394_vm13, %v196_v47 }
  0x2a   :  { %769 = vmatprep.subr.msk.mxu0 %vm107_vm14, %v881_v11  ;;  %831 = vmatprep.mubr.msk.f32.mxu1 %vm394_vm13, %v197_v49 }
  0x2b   :  { %770 = vmatpush3.msk.msra.mxu0 %vm91_vm15, %v881_v11  ;;  %549 = vperm.xlu1 %854, %v531_v58  }
  0x2c   :  { %771 = vmatprep.subr.msk.mxu0 %vm106_vm0, %v881_v11  ;;  %544 = vperm.xlu0 %853, %v530_v59  }
  0x2d   :  { %772 = vmatpush3.msk.msra.mxu0 %vm90_vm1, %v881_v11  ;;  %832 = vmatmul.mubr.msk.f32.gmra.mxu1 %vm394_vm13, %v198_v53 }
  0x2e   :  { %773 = vmatprep.subr.msk.mxu0 %vm105_vm2, %v881_v11  ;;  %842 = vmatprep.mubr.msk.f32.mxu1 %vm211_vm4, %v524_v1 }
  0x2f   :  { %774 = vmatpush3.msk.msra.mxu0 %vm89_vm3, %v881_v11 }
  0x30   :  { %775 = vmatprep.subr.msk.mxu0 %vm104_vm5, %v881_v11 }
  0x31   :  { %776 = vmatpush3.msk.msra.mxu0 %vm88_vm6, %v881_v11 }
  0x32   :  { %777 = vmatprep.subr.msk.mxu0 %vm103_vm7, %v881_v11 }
  0x33   :  { %778 = vmatpush3.msk.msra.mxu0 %vm87_vm8, %v881_v11 }
  0x34   :  { %289 = vmatmul.mubr.f32.vlgmr.msra.gmra.mxu0 %v199_v56 }
  0x35   :  { %293 = vmatprep.mubr.f32.mxu0 %v203_v57 }
  0x38   :  { %294 = vmatmul.mubr.f32.gmra.mxu0 %v202_v60 }
  0x39   :  { %298 = vmatprep.mubr.f32.mxu0 %v206_v61 }
  0x3c   :  { %299 = vmatmul.mubr.f32.gmra.mxu0 %v205_v62 }
  0x3d   :  { %303 = vmatprep.mubr.f32.mxu0 %v209_v63 }
  0x40   :  { %304 = vmatmul.mubr.f32.gmra.mxu0 %v208_v0 }
  0x8c   :  { %v514_v19 = vpop.permute.xlu0 %513  ;;  %v504_v25 = vpop.permute.xlu1 %503 }
  0x90   :  { %v499_v35 = vpop.permute.xlu1 %498 }
  0x91   :  { %v509_v31 = vpop.permute.xlu0 %508 }
  0xa2   :  { %v540_v45 = vpop.permute.xlu1 %539 }
  0xa3   :  { %v535_v46 = vpop.permute.xlu0 %534 }
  0xa6   :  { %v550_v51 = vpop.permute.xlu1 %549 }
  0xa7   :  { %v545_v54 = vpop.permute.xlu0 %544 }
  0xe1   :  { %v822_v2 = vpop.f32.mrf.mxu1 }
  0xe3   :  { %v375_v3 = vpop.f32.mrf.mxu1 }
  0xe5   :  { %v825_v4 = vpop.f32.mrf.mxu1 }
  0xe7   :  { %v385_v6 = vpop.f32.mrf.mxu1 }
  0xe9   :  { %v830_v9 = vpop.f32.mrf.mxu1 }
  0xeb   :  { %v473_v11 = vpop.f32.mrf.mxu1 }
  0xed   :  { %v833_v14 = vpop.f32.mrf.mxu1 }
  0xef   :  { %v483_v22 = vpop.f32.mrf.mxu1 }
  0xf4   :  { %v779_v5 = vpop.f32.mrf.mxu0 }
  0xf6   :  { %v780_v7 = vpop.f32.mrf.mxu0 }
  0xf7   :  { %v781_v18 = vadd.f32 %v780_v7, %v779_v5 }
  0xf8   :  { %v782_v8 = vpop.f32.mrf.mxu0 }
  0xf9   :  { %v376_v26 = vadd.f32 %v781_v18, %v375_v3 }
  0xfa   :  { %v783_v10 = vpop.f32.mrf.mxu0 }
  0xfb   :  { %v784_v15 = vadd.f32 %v783_v10, %v782_v8  ;;  %v474_v32 = vadd.f32 %v473_v11, %v376_v26 }
  0xfc   :  { %v785_v12 = vpop.f32.mrf.mxu0 }
  0xfd   :  { %v381_v23 = vadd.f32 %v822_v2, %v784_v15  ;;  %v516_v38 = vadd.f32 %v499_v35, %v474_v32 }
  0xfe   :  { %v786_v13 = vpop.f32.mrf.mxu0 }
  0xff   :  { %v787_v16 = vadd.f32 %v786_v13, %v785_v12  ;;  %v479_v29 = vadd.f32 %v830_v9, %v381_v23  ;;  %v520_v41 = vmax.f32 %v516_v38, 0.0 }
 0x100   :  { %v788_v17 = vpop.f32.mrf.mxu0 }
 0x101   :  { %v386_v20 = vadd.f32 %v787_v16, %v385_v6  ;;  %v517_v37 = vadd.f32 %v504_v25, %v479_v29 }
 0x102   :  { %v789_v21 = vpop.f32.mrf.mxu0 }
 0x103   :  { %v790_v24 = vadd.f32 %v789_v21, %v788_v17  ;;  %v484_v28 = vadd.f32 %v483_v22, %v386_v20  ;;  %v521_v40 = vmax.f32 %v517_v37, 0.0 }
 0x105   :  { %v391_v27 = vadd.f32 %v825_v4, %v790_v24  ;;  %v518_v33 = vadd.f32 %v509_v31, %v484_v28 }
 0x107   :  { %v489_v30 = vadd.f32 %v833_v14, %v391_v27  ;;  %v522_v39 = vmax.f32 %v518_v33, 0.0 }
 0x109   :  { %v519_v34 = vadd.f32 %v514_v19, %v489_v30 }
 0x10b   :  { %v523_v36 = vmax.f32 %v519_v34, 0.0 }
 0x10d   :  { %834 = vmatprep.subr.mxu1 %v523_v36 }
 0x10e   :  { %835 = vmatpush3.msra.mxu1 %v523_v36 }
 0x10f   :  { %836 = vmatprep.subr.mxu1 %v522_v39 }
 0x110   :  { %837 = vmatpush3.msra.mxu1 %v522_v39 }
 0x111   :  { %838 = vmatprep.subr.mxu1 %v521_v40 }
 0x112   :  { %839 = vmatpush3.msra.mxu1 %v521_v40 }
 0x113   :  { %840 = vmatprep.subr.mxu1 %v520_v41 }
 0x114   :  { %841 = vmatpush3.msra.mxu1 %v520_v41 }
 0x115   :  { %843 = vmatmul.mubr.msk.f32.vlgmr.msra.gmra.mxu1 %vm211_vm4, %v525_v42 }
 0x116   :  { %845 = vmatprep.mubr.msk.f32.mxu1 %vm211_vm4, %v526_v43 }
 0x119   :  { %846 = vmatmul.mubr.msk.f32.gmra.mxu1 %vm211_vm4, %v527_v44 }
 0x1d5   :  { %v844_v47 = vpop.f32.mrf.mxu1 }
 0x1d6   :  { %v636_v48 = vadd.f32 %v844_v47, %v540_v45 }
 0x1d7   :  { %v630_v49 = vpop.f32.mrf.mxu1 }
 0x1d8   :  { %651 = vst.msk [vmem:[%s1159_s6 + $0x8] sm:$0xff] %vm649_vm9, %v636_v48  ;;  %v631_v50 = vadd.f32 %v630_v49, %v535_v46 }
 0x1d9   :  { %v847_v52 = vpop.f32.mrf.mxu1 }
 0x1da   :  { %650 = vst.msk [vmem:[%s1159_s6] sm:$0xff] %vm649_vm9, %v631_v50  ;;  %v646_v53 = vadd.f32 %v847_v52, %v550_v51 }
 0x1db   :  { %v640_v55 = vpop.f32.mrf.mxu1 }
 0x1dc   :  { %653 = vst.msk [vmem:[%s1159_s6 + $0x18] sm:$0xff] %vm649_vm9, %v646_v53  ;;  %v641_v56 = vadd.f32 %v640_v55, %v545_v54 }
 0x1de   :  { %652 = vst.msk [vmem:[%s1159_s6 + $0x10] sm:$0xff] %vm649_vm9, %v641_v56 }
 0x1df   :  { %658 = vsyncpa [#allocation3], 1 }

</bundles_post_ra>
